<compile_context>
chip_gen: v5e
topology: v5e:2x2
jax: 0.10.0
libtpu: 0.0.40
codegen_flags: <defaults>
</compile_context>

<pallas_src>
import jax
import jax.numpy as jnp
from jax.experimental import pallas as pl
from jax.experimental.pallas import tpu as pltpu

_LANE = 128
_TARGET_BLOCK_BYTES = 1 << 20   # ~1 MiB of f32 working data per grid step
_MIN_GRID_STEPS = 8             # enough steps for pipelining + 2 TCs (v7x)


def _round_up(x, m):
    return ((x + m - 1) // m) * m


def _choose_hw_tile(hw, c, n, itemsize):
    """Pick a lane-dense (multiple-of-128) HW tile for a (1, C, T) block."""
    c = max(c, 1)
    hw128 = _round_up(hw, _LANE)
    # Keep per-channel DMA rows >= ~1 KiB so strided HBM bursts stay long.
    min_t = min(hw128, max(_LANE, _round_up(max(1, 1024 // itemsize), _LANE)))
    # Target ~1 MiB of f32 block data (the kernel upcasts to f32 internally).
    t = max(_LANE, (_TARGET_BLOCK_BYTES // (c * 4)) // _LANE * _LANE)
    t = max(min_t, min(t, hw128))
    # Ensure enough grid steps for the megacore split + double-buffer overlap.
    while t > min_t and n * pl.cdiv(hw, t) < _MIN_GRID_STEPS:
        t -= _LANE
    return t


def _vmem_capacity_bytes():
    try:
        return int(pltpu.get_tpu_info().vmem_capacity_bytes)
    except Exception:
        return 64 * 2**20   # conservative: v7x per-TensorCore VMEM


def _l2norm_kernel(scale_ref, x_ref, o_ref):
    # x_ref / o_ref: (1, C, T) tile -- one batch element, all channels, T pixels.
    s = scale_ref[0]                                              # f32 scalar (SMEM)
    x = x_ref[...].astype(jnp.float32)
    ssq = jnp.sum(x * x, axis=1, keepdims=True)                   # (1, 1, T) channel reduce
    # == s * rsqrt(clamp(sum_c((x*s)^2), 1e-12)): exactly the module's math.
    inv = s * jax.lax.rsqrt(jnp.maximum((s * s) * ssq, 1e-12))    # EUP rsqrt
    o_ref[...] = (x * inv).astype(o_ref.dtype)


def l2norm2d(x, scale, out_dtype=None):
    """x: (N, C, H, W) NCHW array; scale: python float or 0-d/1-elem array."""
    N, C, H, W = x.shape
    HW = H * W
    out_dtype = x.dtype if out_dtype is None else jax.dtypes.canonicalize_dtype(out_dtype)

    t_hw = _choose_hw_tile(HW, C, N, x.dtype.itemsize)
    num_hw_blocks = pl.cdiv(HW, t_hw)

    x3 = x.reshape(N, C, HW)                   # contiguous reshape: no HBM copy
    scale_arr = jnp.asarray(scale, dtype=jnp.float32).reshape((1,))

    # VMEM budget: double-buffered in/out blocks + f32 working set + headroom,
    # capped well below the generation's physical per-core VMEM.
    in_block = C * t_hw * x.dtype.itemsize
    out_block = C * t_hw * out_dtype.itemsize
    f32_work = 2 * C * t_hw * 4
    need = 2 * in_block + 2 * out_block + f32_work + (2 << 20)
    vmem_limit = int(min(max(need, 16 * 2**20), (_vmem_capacity_bytes() * 3) // 4))

    out3 = pl.pallas_call(
        _l2norm_kernel,
        out_shape=jax.ShapeDtypeStruct((N, C, HW), out_dtype),
        grid_spec=pltpu.PrefetchScalarGridSpec(
            num_scalar_prefetch=0,
            grid=(N, num_hw_blocks),
            in_specs=[
                pl.BlockSpec(memory_space=pltpu.MemorySpace.SMEM),     # scale scalar
                pl.BlockSpec((1, C, t_hw), lambda n, h: (n, 0, h)),    # x tile
            ],
            out_specs=pl.BlockSpec((1, C, t_hw), lambda n, h: (n, 0, h)),
        ),
        compiler_params=pltpu.CompilerParams(
            dimension_semantics=("parallel", "parallel"),
            vmem_limit_bytes=vmem_limit,
        ),
        # TODO(synk): pass input_output_aliases={1: 0} when the caller donates x
        # (same dtype) to halve peak HBM footprint; HBM traffic is unchanged.
    )(scale_arr, x3)

    return out3.reshape(N, C, H, W)


def l2norm2d_ref(x, scale):
    """Pure-JAX reference mirroring the PyTorch module exactly."""
    xs = x.astype(jnp.float32) * jnp.float32(scale)
    y = jax.lax.rsqrt(jnp.maximum(jnp.sum(xs * xs, axis=1), 1e-12))[:, None, :, :]
    return (xs * y).astype(x.dtype)


if __name__ == "__main__":
    key = jax.random.PRNGKey(0)
    N, C, H, W = 2, 4, 16, 16
    x = jax.random.normal(key, (N, C, H, W), dtype=jnp.float32)
    scale = 20.0

    out = jax.block_until_ready(l2norm2d(x, scale))
    ref = l2norm2d_ref(x, scale)
    assert out.shape == (N, C, H, W)
    assert jnp.allclose(out, ref, atol=1e-5, rtol=1e-5), float(jnp.max(jnp.abs(out - ref)))

    # Smoke-check the partial-last-block path (HW not a multiple of 128) and
    # the reduced-precision (bf16) HBM boundary used for v5e.
    x2 = jax.random.normal(jax.random.PRNGKey(1), (1, 16, 19, 19), dtype=jnp.bfloat16)
    out2 = jax.block_until_ready(l2norm2d(x2, scale))
    ref2 = l2norm2d_ref(x2, scale)
    assert out2.shape == x2.shape
    assert jnp.allclose(out2.astype(jnp.float32), ref2.astype(jnp.float32),
                        atol=2e-2, rtol=2e-2)

    print("KERNEL_OK")
</pallas_src>

<mosaic_0001>
module attributes {stable_mosaic.version = 11 : i64} {
  func.func @_l2norm_kernel(%arg0: i32, %arg1: i32, %arg2: memref<1xf32, #tpu.memory_space<smem>>, %arg3: memref<1x4x256xf32, #tpu.memory_space<vmem>>, %arg4: memref<1x4x256xf32, #tpu.memory_space<vmem>>) attributes {dimension_semantics = [#tpu.dimension_semantics<parallel>, #tpu.dimension_semantics<parallel>], iteration_bounds = array<i64: 2, 1>, scalar_prefetch = 0 : i64, scratch_operands = 0 : i64, tpu.core_type = #tpu.core_type<tc>, window_params = [{transform_indices = @transform_0, window_bounds = array<i64: 1>}, {transform_indices = @transform_1, window_bounds = array<i64: 1, 4, 256>}, {transform_indices = @transform_2, window_bounds = array<i64: 1, 4, 256>}]} {
    %c0 = arith.constant 0 : index
    %0 = memref.load %arg2[%c0] : memref<1xf32, #tpu.memory_space<smem>>
    %c0_0 = arith.constant 0 : index
    %c0_1 = arith.constant 0 : index
    %c0_2 = arith.constant 0 : index
    %1 = vector.load %arg3[%c0_0, %c0_1, %c0_2] : memref<1x4x256xf32, #tpu.memory_space<vmem>>, vector<1x4x256xf32>
    %2 = arith.mulf %1, %1 : vector<1x4x256xf32>
    %cst = arith.constant dense<0.000000e+00> : vector<1x256xf32>
    %3 = vector.multi_reduction <add>, %2, %cst [1] : vector<1x4x256xf32> to vector<1x256xf32>
    %4 = vector.shape_cast %3 : vector<1x256xf32> to vector<1x1x256xf32>
    %5 = arith.mulf %0, %0 : f32
    %6 = vector.broadcast %5 : f32 to vector<1x1x256xf32>
    %7 = arith.mulf %6, %4 : vector<1x1x256xf32>
    %cst_3 = arith.constant 9.99999996E-13 : f32
    %8 = vector.broadcast %cst_3 : f32 to vector<1x1x256xf32>
    %9 = arith.maximumf %7, %8 : vector<1x1x256xf32>
    %10 = math.rsqrt %9 : vector<1x1x256xf32>
    %11 = vector.broadcast %0 : f32 to vector<1x1x256xf32>
    %12 = arith.mulf %11, %10 : vector<1x1x256xf32>
    %13 = vector.broadcast %12 : vector<1x1x256xf32> to vector<1x4x256xf32>
    %14 = arith.mulf %1, %13 : vector<1x4x256xf32>
    %c0_4 = arith.constant 0 : index
    %c0_5 = arith.constant 0 : index
    %c0_6 = arith.constant 0 : index
    %15 = vector.load %arg4[%c0_4, %c0_5, %c0_6] : memref<1x4x256xf32, #tpu.memory_space<vmem>>, vector<1x4x256xf32>
    tpu.vector_store %arg4[%c0_4, %c0_5, %c0_6], %14 {strides = array<i32>} : memref<1x4x256xf32, #tpu.memory_space<vmem>>, vector<1x4x256xf32>,
    return
  }
  func.func @transform_0(%arg0: i32, %arg1: i32) -> i32 {
    %c0_i32 = arith.constant 0 : i32
    %c0_i32_0 = arith.constant 0 : i32
    return %c0_i32 : i32
  }
  func.func @transform_1(%arg0: i32, %arg1: i32) -> (i32, i32, i32) {
    %c0_i32 = arith.constant 0 : i32
    %c0_i32_0 = arith.constant 0 : i32
    return %arg0, %c0_i32, %arg1 : i32, i32, i32
  }
  func.func @transform_2(%arg0: i32, %arg1: i32) -> (i32, i32, i32) {
    %c0_i32 = arith.constant 0 : i32
    %c0_i32_0 = arith.constant 0 : i32
    return %arg0, %c0_i32, %arg1 : i32, i32, i32
  }
}

</mosaic_0001>

<bundles_post_ra>
// kernel: tpu_custom_call.1
= control target key start
LH: loop header
LB: loop body
LE: loop exit
PB: predicated region body
PF: predicated region fallthrough
CT: control target
= control target key end

     0   :  { %s693_s0 = inlined_call_operand.<no memory space> [shape: f32[1], index: 0, kind: input, shape index: {}]   ;;  %s694_s1 = inlined_call_operand.hbm [shape: f32[2,4,256], index: 1, kind: input, shape index: {}]   ;;  %s695_s2 = inlined_call_operand.hbm [shape: f32[2,4,256], index: 2, kind: output, shape index: {}]  }
   0x1   :  { %7 = sst [smem:[#allocation2]] %s693_s0 }
   0x2   :  { %8 = vsyncpa [#allocation4], 0 }
   0x3   :  { %10 = vsyncpa [#allocation4 + $0x1], 0 }
   0x4   :  { %11 = vsyncpa [#allocation5], 0 }
   0x5   :  { %13 = vsyncpa [#allocation5 + $0x1], 0  ;;  %s561_s11 = smov 0   ;;  %s563_s12 = smov 0  }
   0x6   :  { %s565_s13 = smov 0   ;;  %s567_s14 = smov 0  }
   0x7   :  { %s569_s15 = smov 0   ;;  %s571_s16 = smov 0  }
   0x8 LB: > { %s346_s0 = sadd.s32 4294967295, %s541_s16   ;;  %s347_s17 = sadd.s32 4294967294, %s541_s16   ;;  %s541_s16 = sphi %s571_s16, %s19_s16   ;;  %s537_s15 = sphi %s569_s15, %s704_s15   ;;  %s533_s14 = sphi %s567_s14, %s703_s14   ;;  %s529_s13 = sphi %s565_s13, %s702_s13   ;;  %s525_s12 = sphi %s563_s12, %s701_s12   ;;  %s521_s11 = sphi %s561_s11, %s700_s11  }
   0x9   : > { %s31_s18 = sadd.s32 1, %s537_s15  ;;  %s61_s19 = sadd.s32 1, %s529_s13 }
   0xa   : > { %p33_p0 = scmp.ge.s32.totalorder %s31_s18, 2  ;;  %p68_p1 = scmp.ne.s32.totalorder %s529_s13, %s525_s12 }
   0xb   : > { %p69_p2 = scmp.eq.s32.totalorder %s541_s16, 0  ;;  %p74_p3 = scmp.ne.s32.totalorder %s525_s12, %s521_s11 }
   0xc   : > { %s706_s18 = smov (%p33_p0, %s31_s18), 0  ;;  %p75_p5 = scmp.eq.s32.totalorder %s346_s0, 0 }
   0xd   : > { %p602_p4 = por %p69_p2, %p68_p1  ;;  %s56_s21 = ssub.s32 %s537_s15, %s706_s18 }
   0xe   : > { %p100_p6 = scmp.eq.s32.totalorder %s346_s0, 1  ;;  %p59_p7 = scmp.eq.s32.totalorder %s56_s21, 0 }
   0xf   : > { %p608_p8 = por %p75_p5, %p74_p3  ;;  %p106_p10 = scmp.eq.s32.totalorder %s347_s17, 1 }
  0x10   : > { %p612_p9 = por %p100_p6, %p68_p1  ;;  %p349_p12 = scmp.ge.s32.totalorder %s541_s16, 2 }
  0x11   : > { %s617_s24 = scalar_select %p59_p7, %s529_s13, %s61_s19  }
  0x12   : > { %p619_p11 = por %p106_p10, %p74_p3  ;;  %p375_p13 = scmp.lt.s32.totalorder %s541_s16, 2 }
  0x13   : > { %s129_s26 = sand.u32 1, %s529_s13   ;;  %s361_s28 = sshll.u32 %s537_s15, 3 }
  0x14   : > { %s350_s27 = sshll.u32 %s129_s26, 3  ;;  %s140_s3 = scalar_lea.hbm %s694_s1, %s361_s28 }
  0x15   : > { %s133_s4 = scalar_lea.vmem [#allocation3], %s350_s27  ;;  %s142_s6 = sshll.u32 %s140_s3, 4  ;;  %s143_s6 = int_to_ptr.hbm [resolvable:$true] %s142_s6 }
  0x16   : > { %s144_s5 = sshll.u32 %s133_s4, 4  ;;  %p368_p0 = pnand %p375_p13, %p602_p4  ;;  %s145_s5 = int_to_ptr.vmem [resolvable:$true] %s144_s5 }
  0x17   : > { %p353_p1 = scmp.ge.s32.totalorder %s541_s16, 1  ;;  %p149_p2 = scmp.lt.s32.totalorder %s541_s16, 3 }
  0x18   : > { %s130_s7 = scalar_lea.sflag [#allocation4], %s129_s26 }
  0x19   : > { %370 = dma.hbm_to_vmem [thread:$0]  (!%p368_p0), %s143_s6, 128, %s145_s5, %s130_s7  }
  0x1a   : > { %p150_p3 = pnand %p353_p1, %p149_p2 }
  0x1b   : > { %s635_s8 = sand.u32 (!%p150_p3), 1, %s525_s12  }
  0x1c   : > { %153 = sbr.rel (%p150_p3) target bundleno = 91 (0x5b), region = 28  ;;  %s354_s9 = sshll.u32 (!%p150_p3), %s635_s8, 3 }
  0x1d   : > { %s156_s10 = scalar_lea.sflag (!%p150_p3), [#allocation4], %s635_s8  ;;  %s159_s0 = scalar_lea.vmem (!%p150_p3), [#allocation3], %s354_s9 }
  0x21   : > { %512 = dma.done.wait (%p608_p8), %s156_s10, 128  }
  0x22   : > { %514 = vsyncadd (%p608_p8), %s156_s10, 4294967168  ;;  %v184_v0 = vld [vmem:[%s159_s0] sm:$0xff]  ;;  %vm192_vm0 = vcmask 1043456   ;;  %s645_s17 = sld [smem:[#allocation2]]  ;;  %s362_s20 = sshll.u32 %s533_s14, 3 }
  0x23   : > { %v185_v1 = vmul.f32 %v184_v0, %v184_v0  ;;  %s257_s26 = scalar_lea.hbm %s695_s2, %s362_s20  ;;  %s180_s27 = scalar_lea.vmem [#allocation6], %s354_s9 }
  0x24   : > { %s259_s28 = sshll.u32 %s180_s27, 4  ;;  %s261_s14 = sshll.u32 %s257_s26, 4  ;;  %s260_s28 = int_to_ptr.vmem [resolvable:$true] %s259_s28  ;;  %s262_s14 = int_to_ptr.hbm [resolvable:$true] %s261_s14 }
  0x25   : > { %187 = vst [vmem:[#allocation1] ss:$2 sm:$0xff] %v185_v1  ;;  %s244_s29 = scalar_lea.sflag [#allocation5], %s635_s8  ;;  %s473_s30 = sshra.s32 %s262_s14, 4  ;;  %s474_s30 = int_to_ptr.hbm [resolvable:$true] %s473_s30 }
  0x26   : > { %s475_s3 = scalar_lea.hbm %s474_s30, 8  ;;  %s479_s6 = scalar_lea.hbm %s695_s2, 16 }
  0x27   : > { %p476_p4 = scmp.ne.s32.totalorder %s474_s30, %s475_s3  ;;  %p480_p7 = scmp.lt.s32.totalorder %s474_s30, %s695_s2 }
  0x28   : > { %s207_s19 = smul.f32 %s645_s17, %s645_s17  ;;  %v233_v35 = vstv %s645_s17  ;;  %p481_p8 = scmp.lt.s32.totalorder %s479_s6, %s475_s3 }
  0x29   : > { %p477_p5 = pnand %p476_p4, %p612_p9 }
  0x2a   : > { %v208_v16 = vstv %s207_s19  ;;  %p482_p10 = por %p481_p8, %p480_p7 }
  0x2b   : > { %p478_p6 = pneg %p477_p5 }
  0x2c   : > { %v188_v2 = vld.sshfl [vmem:[#allocation1] sm:$0xff pattern:$0x75316420]  ;;  %v189_v3 = vld.sshfl [vmem:[#allocation1 + $0x8] sm:$0xff pattern:$0x75316420] }
  0x2d   : > { %v193_v4 = vsel %vm192_vm0, %v188_v2, 0.0  ;;  %v200_v5 = vsel %vm192_vm0, %v189_v3, 0.0  ;;  %p483_p13 = pnand %p482_p10, %p478_p6 }
  0x2e   : > { %v194_v6 = vrot.slane %v193_v4, 4  ;;  %v201_v7 = vrot.slane %v200_v5, 4 }
  0x30   : > { %v195_v8 = vadd.f32 %v194_v6, %v193_v4  ;;  %v202_v9 = vadd.f32 %v201_v7, %v200_v5 }
  0x32   : > { %v196_v10 = vrot.slane %v195_v8, 2  ;;  %v203_v11 = vrot.slane %v202_v9, 2 }
  0x34   : > { %v197_v12 = vadd.f32 %v196_v10, %v195_v8  ;;  %v204_v13 = vadd.f32 %v203_v11, %v202_v9 }
  0x36   : > { %v198_v14 = vrot.slane %v197_v12, 1  ;;  %v205_v15 = vrot.slane %v204_v13, 1 }
  0x38   : > { %v199_v17 = vadd.f32 %v198_v14, %v197_v12  ;;  %v206_v18 = vadd.f32 %v205_v15, %v204_v13 }
  0x3a   : > { %v209_v19 = vmul.f32 %v208_v16, %v199_v17  ;;  %v210_v20 = vmul.f32 %v208_v16, %v206_v18 }
  0x3c   : > { %v211_v21 = vmax.f32 %v209_v19, 1e-12  ;;  %v212_v22 = vmax.f32 %v210_v20, 1e-12 }
  0x3e   : > { %425 = vrsqrt.f32 %v211_v21  ;;  %vm219_vm3 = vweird.f32 %v211_v21  ;;  %vm229_vm5 = vweird.f32 %v212_v22 }
  0x3f   : > { %427 = vrsqrt.f32 %v212_v22 }
  0x44   : > { %v426_v23 = vpop.eup %425 }
  0x45   : > { %v428_v24 = vpop.eup %427  ;;  %v214_v25 = vmul.f32 %v426_v23, %v211_v21  ;;  %vm220_vm1 = vweird.f32 %v426_v23 }
  0x46   : > { %v224_v26 = vmul.f32 %v428_v24, %v212_v22  ;;  %vm230_vm2 = vweird.f32 %v428_v24  ;;  %vm221_vm4 = vmor %vm219_vm3, %vm220_vm1 }
  0x47   : > { %v215_v27 = vmul.f32 %v426_v23, %v214_v25  ;;  %vm231_vm6 = vmor %vm229_vm5, %vm230_vm2 }
  0x48   : > { %v225_v28 = vmul.f32 %v428_v24, %v224_v26 }
  0x49   : > { %v216_v29 = vmul.f32 0.5, %v215_v27 }
  0x4a   : > { %v226_v30 = vmul.f32 0.5, %v225_v28 }
  0x4b   : > { %v217_v31 = vsub.f32 1.5, %v216_v29 }
  0x4c   : > { %v227_v32 = vsub.f32 1.5, %v226_v30 }
  0x4d   : > { %v218_v33 = vmul.f32 %v426_v23, %v217_v31 }
  0x4e   : > { %v228_v34 = vmul.f32 %v428_v24, %v227_v32 }
  0x4f   : > { %v222_v36 = vsel %vm221_vm4, %v426_v23, %v218_v33 }
  0x50   : > { %v232_v37 = vsel %vm231_vm6, %v428_v24, %v228_v34  ;;  %v234_v39 = vmul.f32 %v233_v35, %v222_v36 }
  0x51   : > { %v235_v38 = vmul.f32 %v233_v35, %v232_v37 }
  0x53   : > { %v238_v40 = vrot.slane %v235_v38, 4 }
  0x55   : > { %v239_v41 = vsel %vm192_vm0, %v234_v39, %v238_v40 }
  0x56   : > { %v241_v42 = vmul.f32 %v239_v41, %v184_v0 }
  0x58   : > { %242 = vst [vmem:[%s180_s27] sm:$0xff] %v241_v42 }
  0x59   : > { %486 = shalt.err (!%p483_p13)
}
  0x5a   : > { %365 = dma.vmem_to_hbm [thread:$0]  (%p612_p9), %s260_s28, 128, %s262_s14, %s244_s29  }
  0x5b PF: > { %s273_s8 = sand.u32 1, %s521_s11   ;;  %p372_p0 = pnand %p349_p12, %p619_p11 }
  0x5c   : > { %s274_s10 = scalar_lea.sflag [#allocation5], %s273_s8 }
  0x5d   : > { %p373_p1 = pneg %p372_p0 }
  0x5f   : > { %516 = dma.done.wait (%p373_p1), %s274_s10, 128  }
  0x60   : > { %518 = vsyncadd (%p373_p1), %s274_s10, 4294967168  ;;  %s19_s16 = sadd.s32 1, %s541_s16   ;;  %s700_s11 = smov %s525_s12 }
  0x61   : > { %p16_p2 = scmp.ge.s32.totalorder %s19_s16, 4   ;;  %s701_s12 = smov %s529_s13 }
  0x62   : > { %s702_s13 = smov %s617_s24  ;;  %s703_s14 = smov %s537_s15 }
  0x63   : > { %s704_s15 = smov %s706_s18  ;;  %18 = sbr.rel (!%p16_p2) target bundleno = 8 (0x8), region = 73 }
  0x68   :  { %280 = vsyncpa [#allocation4], 1 }
  0x69   :  { %282 = vsyncpa [#allocation4 + $0x1], 1 }
  0x6a   :  { %283 = vsyncpa [#allocation5], 1 }
  0x6b   :  { %285 = vsyncpa [#allocation5 + $0x1], 1 }

</bundles_post_ra>
